<compile_context>
chip_gen: v6e
topology: v6e:2x2x1
jax: 0.10.0
libtpu: 0.0.40
codegen_flags: <defaults>
</compile_context>

<pallas_src>
import functools
import math

import jax
import jax.numpy as jnp
from jax import lax
from jax.experimental import pallas as pl
from jax.experimental.pallas import tpu as pltpu


# -----------------------------------------------------------------------------
# Kernels
# -----------------------------------------------------------------------------

def _resident_gather_kernel(ids_ref, emb_ref, o_ref, *, scale):
    """VMEM-resident table: gather T rows via a one-hot MXU matmul.

    ids_ref : VMEM (T, 1) int32   -- this grid step's token ids
    emb_ref : VMEM (V, D)         -- full table, resident across the grid
    o_ref   : VMEM (T, D)         -- scaled output tile (lane-dense writeback)
    """
    ids = ids_ref[...]                                       # (T, 1) int32
    t = ids.shape[0]
    v = emb_ref.shape[0]
    vocab = lax.broadcasted_iota(jnp.int32, (t, v), 1)       # (T, V)
    onehot = (ids == vocab).astype(emb_ref.dtype)            # exact 0/1 mask
    rows = jnp.dot(onehot, emb_ref[...],
                   preferred_element_type=jnp.float32)       # (T, D), exact gather
    o_ref[...] = (rows * scale).astype(o_ref.dtype)


def _hbm_gather_kernel(ids_ref, emb_hbm, o_ref, sem, *, scale, tokens):
    """HBM table: T concurrent row DMAs straight into the output tile.

    ids_ref : SMEM (chunk,) int32 -- scalar-prefetched token ids
    emb_hbm : HBM  (V, D)         -- embedding table (memory_space=pl.ANY)
    o_ref   : VMEM (T, D)         -- DMA destination + scaled output tile
    sem     : single DMA semaphore shared by all T row copies
    """
    base = pl.program_id(0) * tokens

    def issue(t, carry):
        row = ids_ref[base + t]
        pltpu.make_async_copy(
            emb_hbm.at[pl.ds(row, 1), :],
            o_ref.at[pl.ds(t, 1), :],
            sem,
        ).start()
        return carry

    lax.fori_loop(0, tokens, issue, 0)

    def drain(t, carry):
        # Only the transfer size + semaphore matter for a wait; reuse row 0.
        pltpu.make_async_copy(
            emb_hbm.at[pl.ds(0, 1), :],
            o_ref.at[pl.ds(0, 1), :],
            sem,
        ).wait()
        return carry

    lax.fori_loop(0, tokens, drain, 0)

    # Scale in place on the VPU (free under DMA slack); out BlockSpec pipelines
    # the HBM writeback.
    o_ref[...] = (o_ref[...] * scale).astype(o_ref.dtype)


# -----------------------------------------------------------------------------
# Wrapper helpers
# -----------------------------------------------------------------------------

def _pick_tile(m, d, itemsize, tokens_per_block, out_tile_bytes):
    """Pick tokens-per-block T, grid size, and padded length Mp.

    T is sublane-aligned for the table dtype (8 f32 / 16 bf16 / 32 int8), capped
    by the requested block size and by a VMEM budget for the double-buffered
    output tile.  Prefers T | M so no padded rows (and no wrapper slice copy)
    are needed.
    """
    sub = max(8, 32 // itemsize)
    cap = min(tokens_per_block, max(1, out_tile_bytes // max(1, d * itemsize)))
    cap = max(sub, (cap // sub) * sub)
    if m <= cap:
        return m, 1, m                      # single block == whole array
    t = cap
    while t >= max(sub, cap // 2):
        if m % t == 0:
            return t, m // t, m             # exact tiling, no tail padding
        t -= sub
    n = -(-m // cap)                        # fall back: pad, slice tail later
    return cap, n, n * cap


def _compiler_params(buffer_bytes):
    # Buffers are sized to fit the 32 MiB scoped-VMEM default on v5e/v6e/v7x;
    # only raise the limit when a caller passes larger budgets.
    vmem_limit = None
    if buffer_bytes > 24 * (1 << 20):
        vmem_limit = int(min(buffer_bytes + (16 << 20), 120 << 20))
    return pltpu.CompilerParams(
        dimension_semantics=("parallel",),   # grid steps are independent
        vmem_limit_bytes=vmem_limit,
    )


def _lookup_resident(flat_ids, emb_table, scale, tokens_per_block, out_tile_bytes):
    (m,) = flat_ids.shape
    v, d = emb_table.shape
    itemsize = emb_table.dtype.itemsize
    t, n_blocks, mp = _pick_tile(m, d, itemsize, tokens_per_block, out_tile_bytes)
    if mp != m:
        flat_ids = jnp.pad(flat_ids, (0, mp - m))       # pad with token 0
    ids2d = flat_ids.reshape(mp, 1)

    cost = pl.CostEstimate(
        flops=2 * mp * v * d + mp * d,
        transcendentals=0,
        bytes_accessed=mp * 4 + v * d * itemsize + mp * d * itemsize,
    )

    out = pl.pallas_call(
        functools.partial(_resident_gather_kernel, scale=scale),
        out_shape=jax.ShapeDtypeStruct((mp, d), emb_table.dtype),
        grid_spec=pltpu.PrefetchScalarGridSpec(
            num_scalar_prefetch=0,
            grid=(n_blocks,),
            in_specs=[
                pl.BlockSpec((t, 1), lambda i: (i, 0)),   # ids tile (VMEM)
                pl.BlockSpec((v, d), lambda i: (0, 0)),   # table: resident in VMEM
            ],
            out_specs=pl.BlockSpec((t, d), lambda i: (i, 0)),
        ),
        compiler_params=_compiler_params(
            2 * v * d * itemsize + 2 * t * d * itemsize + 2 * t * 4),
        cost_estimate=cost,
    )(ids2d, emb_table)
    return out[:m] if mp != m else out


def _lookup_hbm(flat_ids, emb_table, scale, tokens_per_block, out_tile_bytes):
    (m,) = flat_ids.shape
    v, d = emb_table.shape
    itemsize = emb_table.dtype.itemsize
    t, n_blocks, mp = _pick_tile(m, d, itemsize, tokens_per_block, out_tile_bytes)
    if mp != m:
        flat_ids = jnp.pad(flat_ids, (0, mp - m))       # pad with token 0

    cost = pl.CostEstimate(
        flops=mp * d,                                    # just the scale multiply
        transcendentals=0,
        bytes_accessed=mp * 4 + 2 * mp * d * itemsize,   # ids + gathered rows + output
    )

    out = pl.pallas_call(
        functools.partial(_hbm_gather_kernel, scale=scale, tokens=t),
        out_shape=jax.ShapeDtypeStruct((mp, d), emb_table.dtype),
        grid_spec=pltpu.PrefetchScalarGridSpec(
            num_scalar_prefetch=1,                       # ids -> SMEM
            grid=(n_blocks,),
            in_specs=[pl.BlockSpec(memory_space=pl.ANY)],  # table stays in HBM
            out_specs=pl.BlockSpec((t, d), lambda i, ids: (i, 0)),
            scratch_shapes=[pltpu.SemaphoreType.DMA],    # single shared DMA sem
        ),
        compiler_params=_compiler_params(2 * t * d * itemsize),
        cost_estimate=cost,
    )(flat_ids, emb_table)
    return out[:m] if mp != m else out


def embedding_lookup(ids, emb_table, *, tokens_per_block=256,
                     resident_table_bytes=8 * 1024 * 1024,
                     out_tile_bytes=4 * 1024 * 1024,
                     max_prefetch_ids=32768,
                     force_hbm_path=False):
    """ids: int (B, S); emb_table: (V, d_model). Returns emb[ids] * sqrt(d_model)."""
    b, s = ids.shape
    v, d = emb_table.shape
    scale = math.sqrt(d)
    itemsize = emb_table.dtype.itemsize

    m = b * s
    flat_ids = ids.reshape(m).astype(jnp.int32)

    use_resident = (v * d * itemsize <= resident_table_bytes) and not force_hbm_path
    if use_resident:
        out = _lookup_resident(flat_ids, emb_table, scale,
                               tokens_per_block, out_tile_bytes)
    else:
        # Scalar-prefetched ids live in SMEM (1-D SMEM pads to next_pow2(4*N)
        # bytes), so chunk very long token streams to bound SMEM per call.
        chunks = []
        for start in range(0, m, max_prefetch_ids):
            chunks.append(_lookup_hbm(flat_ids[start:start + max_prefetch_ids],
                                      emb_table, scale,
                                      tokens_per_block, out_tile_bytes))
        out = chunks[0] if len(chunks) == 1 else jnp.concatenate(chunks, axis=0)

    return out.reshape(b, s, d)


def init_embedding(key, num_embeddings, d_model, pad_id, dtype=jnp.float32):
    """Mimics nn.Embedding init: N(0,1) weights, padding row zeroed."""
    w = jax.random.normal(key, (num_embeddings, d_model), dtype)
    return w.at[pad_id].set(0.0)


if __name__ == "__main__":
    key = jax.random.PRNGKey(0)
    k_ids, k_emb = jax.random.split(key)

    # Small shapes consistent with the module; d_model kept lane-dense (>=128).
    num_embeddings, pad_id, d_model = 512, 0, 128
    B, S = 2, 8

    ids = jax.random.randint(k_ids, (B, S), 0, num_embeddings, dtype=jnp.int32)
    ids = ids.at[0, 0].set(pad_id)          # include a padding token
    emb = init_embedding(k_emb, num_embeddings, d_model, pad_id)

    # Pure-JAX reference: gather + sqrt(d_model) scale (pad row is zero -> stays zero).
    ref = jnp.take(emb, ids, axis=0) * math.sqrt(d_model)

    # Fast path: 256 KiB table is VMEM-resident; gather runs on the MXU.
    out_fast = jax.block_until_ready(embedding_lookup(ids, emb))
    assert out_fast.shape == (B, S, d_model)
    assert jnp.allclose(out_fast, ref, atol=1e-5, rtol=1e-5)

    # General path: table stays in HBM, per-row DMA gather straight into o_ref.
    # Exercised explicitly so both code paths are validated on hardware.
    out_hbm = jax.block_until_ready(embedding_lookup(ids, emb, force_hbm_path=True))
    assert out_hbm.shape == (B, S, d_model)
    assert jnp.allclose(out_hbm, ref, atol=1e-5, rtol=1e-5)

    # TODO(synk): backward-pass padding_idx gradient masking is a training-only
    #             nn.Embedding behavior and is out of scope for this forward kernel.
    print("KERNEL_OK")
</pallas_src>

<mosaic_0001>
module attributes {stable_mosaic.version = 11 : i64} {
  func.func @_resident_gather_kernel(%arg0: i32, %arg1: memref<16x1xi32, #tpu.memory_space<vmem>>, %arg2: memref<512x128xf32, #tpu.memory_space<vmem>>, %arg3: memref<16x128xf32, #tpu.memory_space<vmem>>) attributes {dimension_semantics = [#tpu.dimension_semantics<parallel>], iteration_bounds = array<i64: 1>, scalar_prefetch = 0 : i64, scratch_operands = 0 : i64, tpu.core_type = #tpu.core_type<tc>, window_params = [{transform_indices = @transform_0, window_bounds = array<i64: 16, 1>}, {pipeline_mode = #tpu.pipeline_mode<synchronous>, transform_indices = @transform_1, window_bounds = array<i64: 512, 128>}, {transform_indices = @transform_2, window_bounds = array<i64: 16, 128>}]} {
    %c0 = arith.constant 0 : index
    %c0_0 = arith.constant 0 : index
    %0 = vector.load %arg1[%c0, %c0_0] : memref<16x1xi32, #tpu.memory_space<vmem>>, vector<16x1xi32>
    %1 = tpu.iota {dimensions = array<i32: 1>} : vector<16x512xi32>
    %2 = vector.broadcast %0 : vector<16x1xi32> to vector<16x512xi32>
    %3 = arith.cmpi eq, %2, %1 : vector<16x512xi32>
    %4 = arith.extui %3 : vector<16x512xi1> to vector<16x512xi32>
    %5 = arith.sitofp %4 : vector<16x512xi32> to vector<16x512xf32>
    %c0_1 = arith.constant 0 : index
    %c0_2 = arith.constant 0 : index
    %6 = vector.load %arg2[%c0_1, %c0_2] : memref<512x128xf32, #tpu.memory_space<vmem>>, vector<512x128xf32>
    %cst = arith.constant dense<0.000000e+00> : vector<16x128xf32>
    %7 = tpu.matmul %5, %6, %cst {dimension_numbers = #tpu.dot_dimension_numbers<[1], [0], [0], [1], [0, 0, 1, 1], [], []>} : vector<16x512xf32>, vector<512x128xf32>, vector<16x128xf32> -> vector<16x128xf32>
    %cst_3 = arith.constant 11.3137083 : f32
    %8 = vector.broadcast %cst_3 : f32 to vector<16x128xf32>
    %9 = arith.mulf %7, %8 : vector<16x128xf32>
    %c0_4 = arith.constant 0 : index
    %c0_5 = arith.constant 0 : index
    %10 = vector.load %arg3[%c0_4, %c0_5] : memref<16x128xf32, #tpu.memory_space<vmem>>, vector<16x128xf32>
    tpu.vector_store %arg3[%c0_4, %c0_5], %9 {strides = array<i32>} : memref<16x128xf32, #tpu.memory_space<vmem>>, vector<16x128xf32>,
    return
  }
  func.func @transform_0(%arg0: i32) -> (i32, i32) {
    %c0_i32 = arith.constant 0 : i32
    %c0_i32_0 = arith.constant 0 : i32
    return %arg0, %c0_i32 : i32, i32
  }
  func.func @transform_1(%arg0: i32) -> (i32, i32) {
    %c0_i32 = arith.constant 0 : i32
    %c0_i32_0 = arith.constant 0 : i32
    %c0_i32_1 = arith.constant 0 : i32
    return %c0_i32, %c0_i32_0 : i32, i32
  }
  func.func @transform_2(%arg0: i32) -> (i32, i32) {
    %c0_i32 = arith.constant 0 : i32
    %c0_i32_0 = arith.constant 0 : i32
    return %arg0, %c0_i32 : i32, i32
  }
}

</mosaic_0001>

<bundles_post_ra>
// kernel: tpu_custom_call.1
= control target key start
LH: loop header
LB: loop body
LE: loop exit
PB: predicated region body
PF: predicated region fallthrough
CT: control target
= control target key end

     0   :  { %7 = vsyncpa [#allocation3], 0  ;;  %s480_s0 = inlined_call_operand.vmem [shape: s32[16,1], index: 0, kind: input, shape index: {}]   ;;  %s481_s1 = inlined_call_operand.hbm [shape: f32[512,128], index: 1, kind: input, shape index: {}]   ;;  %s482_s2 = inlined_call_operand.hbm [shape: f32[16,128], index: 2, kind: output, shape index: {}]  }
   0x1   :  { %8 = vsyncpa [#allocation4], 0  ;;  %s441_s9 = smov [#allocation2]  }
   0x2   :  { %s16_s10 = sshll.u32 %s441_s9, 4  ;;  %s17_s10 = int_to_ptr.vmem [resolvable:$true] %s16_s10 }
   0x3   :  { %s405_s11 = scalar_lea.vmem %s17_s10, 8192  ;;  %p410_p1 = scmp.lt.s32.totalorder %s17_s10, %s17_s10 }
   0x4   :  { %p406_p0 = scmp.ne.s32.totalorder %s17_s10, %s405_s11  ;;  %p411_p2 = scmp.lt.s32.totalorder %s405_s11, %s405_s11 }
   0x6   :  { %p412_p3 = por %p411_p2, %p410_p1 }
   0x8   :  { %p413_p4 = pnand %p412_p3, %p406_p0 }
   0xa   :  { %416 = shalt.err (!%p413_p4)
}
   0xb   :  { %s442_s12 = smov 128   ;;  %s443_s13 = smov 8  }
   0xc   :  { %22 = dma.hbm_to_vmem [thread:$0]  %s481_s1, 8192, %s17_s10, [#allocation3], %s442_s12, %s442_s12, %s443_s13  }
   0xd   :  { %437 = dma.done.wait [#allocation3], 8192  }
   0xe   :  { %438 = vsyncadd [#allocation3], 4294959104  ;;  %v444_v0 = vmov 0   ;;  %v26_v1 = vld [vmem:[%s480_s0] sm:$0xff]  ;;  %v27_v2 = vld [vmem:[%s480_s0 + $0x8] sm:$0xff]  ;;  %s446_s0 = smov [#allocation5]  }
   0xf   :  { %396 = vset.pattern.permute.xlu0 %v444_v0  ;;  %v94_v3 = vld [vmem:[#allocation2 + $0xf8] sm:$0xff]  ;;  %v93_v7 = vld [vmem:[#allocation2 + $0xf0] sm:$0xff]  ;;  %v92_v11 = vld [vmem:[#allocation2 + $0xe8] sm:$0xff]  ;;  %s286_s1 = sshll.u32 %s446_s0, 4  ;;  %s287_s1 = int_to_ptr.vmem [resolvable:$true] %s286_s1 }
  0x10   :  { %34 = vperm.xlu0 %396, %v26_v1   ;;  %314 = vmatprep.subr.mxu0 %v94_v3  ;;  %v126_v4 = vld [vmem:[#allocation2 + $0x1f8] sm:$0xff]  ;;  %v125_v8 = vld [vmem:[#allocation2 + $0x1f0] sm:$0xff]  ;;  %v124_v12 = vld [vmem:[#allocation2 + $0x1e8] sm:$0xff]  ;;  %v28_v3 = vlaneseq  ;;  %s417_s20 = scalar_lea.vmem %s287_s1, 256  ;;  %p422_p6 = scmp.lt.s32.totalorder %s287_s1, %s287_s1 }
  0x11   :  { %v78_v5 = vld [vmem:[#allocation2 + $0x78] sm:$0xff]  ;;  %352 = vmatprep.subr.mxu1 %v126_v4  ;;  %v77_v9 = vld [vmem:[#allocation2 + $0x70] sm:$0xff]  ;;  %v76_v13 = vld [vmem:[#allocation2 + $0x68] sm:$0xff]  ;;  %p418_p5 = scmp.ne.s32.totalorder %s287_s1, %s417_s20  ;;  %p423_p7 = scmp.lt.s32.totalorder %s417_s20, %s417_s20 }
  0x12   :  { %v110_v6 = vld [vmem:[#allocation2 + $0x178] sm:$0xff]  ;;  %315 = vmatpush3.msra.mxu0 %v78_v5  ;;  %v109_v10 = vld [vmem:[#allocation2 + $0x170] sm:$0xff]  ;;  %v108_v14 = vld [vmem:[#allocation2 + $0x168] sm:$0xff]  ;;  %v29_v4 = vand.u32 127, %v28_v3 }
  0x13   :  { %353 = vmatpush3.msra.mxu1 %v110_v6  ;;  %316 = vmatprep.subr.mxu0 %v93_v7  ;;  %v91_v15 = vld [vmem:[#allocation2 + $0xe0] sm:$0xff]  ;;  %v90_v19 = vld [vmem:[#allocation2 + $0xd8] sm:$0xff]  ;;  %v89_v23 = vld [vmem:[#allocation2 + $0xd0] sm:$0xff]  ;;  %p424_p8 = por %p423_p7, %p422_p6 }
  0x14   :  { %354 = vmatprep.subr.mxu1 %v125_v8  ;;  %317 = vmatpush3.msra.mxu0 %v77_v9  ;;  %v123_v16 = vld [vmem:[#allocation2 + $0x1e0] sm:$0xff]  ;;  %v122_v20 = vld [vmem:[#allocation2 + $0x1d8] sm:$0xff]  ;;  %v121_v24 = vld [vmem:[#allocation2 + $0x1d0] sm:$0xff]  ;;  %v30_v5 = vadd.s32 128, %v29_v4  ;;  %v32_v6 = vadd.s32 384, %v29_v4  ;;  %v31_v7 = vadd.s32 256, %v29_v4 }
  0x15   :  { %37 = vperm.xlu0 %396, %v27_v2   ;;  %355 = vmatpush3.msra.mxu1 %v109_v10  ;;  %v75_v17 = vld [vmem:[#allocation2 + $0x60] sm:$0xff]  ;;  %v74_v21 = vld [vmem:[#allocation2 + $0x58] sm:$0xff]  ;;  %v73_v25 = vld [vmem:[#allocation2 + $0x50] sm:$0xff]  ;;  %v445_v9 = vmov 1.0   ;;  %p425_p9 = pnand %p424_p8, %p418_p5 }
  0x16   :  { %318 = vmatprep.subr.mxu0 %v92_v11  ;;  %356 = vmatprep.subr.mxu1 %v124_v12  ;;  %v107_v18 = vld [vmem:[#allocation2 + $0x160] sm:$0xff]  ;;  %v106_v22 = vld [vmem:[#allocation2 + $0x158] sm:$0xff]  ;;  %v105_v26 = vld [vmem:[#allocation2 + $0x150] sm:$0xff] }
  0x17   :  { %319 = vmatpush3.msra.mxu0 %v76_v13  ;;  %357 = vmatpush3.msra.mxu1 %v108_v14  ;;  %v88_v27 = vld [vmem:[#allocation2 + $0xc8] sm:$0xff]  ;;  %v87_v31 = vld [vmem:[#allocation2 + $0xc0] sm:$0xff]  ;;  %v86_v35 = vld [vmem:[#allocation2 + $0xb8] sm:$0xff] }
  0x18   :  { %320 = vmatprep.subr.mxu0 %v91_v15  ;;  %358 = vmatprep.subr.mxu1 %v123_v16  ;;  %v120_v28 = vld [vmem:[#allocation2 + $0x1c8] sm:$0xff]  ;;  %v119_v32 = vld [vmem:[#allocation2 + $0x1c0] sm:$0xff]  ;;  %v118_v36 = vld [vmem:[#allocation2 + $0x1b8] sm:$0xff] }
  0x19   :  { %321 = vmatpush3.msra.mxu0 %v75_v17  ;;  %359 = vmatpush3.msra.mxu1 %v107_v18  ;;  %v72_v29 = vld [vmem:[#allocation2 + $0x48] sm:$0xff]  ;;  %v71_v33 = vld [vmem:[#allocation2 + $0x40] sm:$0xff]  ;;  %v70_v37 = vld [vmem:[#allocation2 + $0x38] sm:$0xff] }
  0x1a   :  { %322 = vmatprep.subr.mxu0 %v90_v19  ;;  %360 = vmatprep.subr.mxu1 %v122_v20  ;;  %v104_v30 = vld [vmem:[#allocation2 + $0x148] sm:$0xff]  ;;  %v103_v34 = vld [vmem:[#allocation2 + $0x140] sm:$0xff]  ;;  %v102_v38 = vld [vmem:[#allocation2 + $0x138] sm:$0xff] }
  0x1b   :  { %323 = vmatpush3.msra.mxu0 %v74_v21  ;;  %361 = vmatpush3.msra.mxu1 %v106_v22  ;;  %v85_v39 = vld [vmem:[#allocation2 + $0xb0] sm:$0xff]  ;;  %v84_v43 = vld [vmem:[#allocation2 + $0xa8] sm:$0xff]  ;;  %v83_v47 = vld [vmem:[#allocation2 + $0xa0] sm:$0xff] }
  0x1c   :  { %324 = vmatprep.subr.mxu0 %v89_v23  ;;  %362 = vmatprep.subr.mxu1 %v121_v24  ;;  %v117_v40 = vld [vmem:[#allocation2 + $0x1b0] sm:$0xff]  ;;  %v116_v44 = vld [vmem:[#allocation2 + $0x1a8] sm:$0xff]  ;;  %v115_v48 = vld [vmem:[#allocation2 + $0x1a0] sm:$0xff] }
  0x1d   :  { %325 = vmatpush3.msra.mxu0 %v73_v25  ;;  %363 = vmatpush3.msra.mxu1 %v105_v26  ;;  %v69_v41 = vld [vmem:[#allocation2 + $0x30] sm:$0xff]  ;;  %v68_v45 = vld [vmem:[#allocation2 + $0x28] sm:$0xff]  ;;  %v67_v49 = vld [vmem:[#allocation2 + $0x20] sm:$0xff] }
  0x1e   :  { %326 = vmatprep.subr.mxu0 %v88_v27  ;;  %364 = vmatprep.subr.mxu1 %v120_v28  ;;  %v101_v42 = vld [vmem:[#allocation2 + $0x130] sm:$0xff]  ;;  %v100_v46 = vld [vmem:[#allocation2 + $0x128] sm:$0xff]  ;;  %v99_v50 = vld [vmem:[#allocation2 + $0x120] sm:$0xff] }
  0x1f   :  { %327 = vmatpush3.msra.mxu0 %v72_v29  ;;  %365 = vmatpush3.msra.mxu1 %v104_v30  ;;  %v82_v51 = vld [vmem:[#allocation2 + $0x98] sm:$0xff]  ;;  %v81_v55 = vld [vmem:[#allocation2 + $0x90] sm:$0xff]  ;;  %v80_v59 = vld [vmem:[#allocation2 + $0x88] sm:$0xff] }
  0x20   :  { %328 = vmatprep.subr.mxu0 %v87_v31  ;;  %366 = vmatprep.subr.mxu1 %v119_v32  ;;  %v114_v52 = vld [vmem:[#allocation2 + $0x198] sm:$0xff]  ;;  %v113_v56 = vld [vmem:[#allocation2 + $0x190] sm:$0xff]  ;;  %v112_v60 = vld [vmem:[#allocation2 + $0x188] sm:$0xff] }
  0x21   :  { %329 = vmatpush3.msra.mxu0 %v71_v33  ;;  %367 = vmatpush3.msra.mxu1 %v103_v34  ;;  %v66_v53 = vld [vmem:[#allocation2 + $0x18] sm:$0xff]  ;;  %v65_v57 = vld [vmem:[#allocation2 + $0x10] sm:$0xff]  ;;  %v64_v61 = vld [vmem:[#allocation2 + $0x8] sm:$0xff] }
  0x22   :  { %330 = vmatprep.subr.mxu0 %v86_v35  ;;  %368 = vmatprep.subr.mxu1 %v118_v36  ;;  %v98_v54 = vld [vmem:[#allocation2 + $0x118] sm:$0xff]  ;;  %v97_v58 = vld [vmem:[#allocation2 + $0x110] sm:$0xff]  ;;  %v96_v62 = vld [vmem:[#allocation2 + $0x108] sm:$0xff] }
  0x23   :  { %331 = vmatpush3.msra.mxu0 %v70_v37  ;;  %369 = vmatpush3.msra.mxu1 %v102_v38  ;;  %v79_v63 = vld [vmem:[#allocation2 + $0x80] sm:$0xff] }
  0x24   :  { %332 = vmatprep.subr.mxu0 %v85_v39  ;;  %370 = vmatprep.subr.mxu1 %v117_v40  ;;  %v111_v0 = vld [vmem:[#allocation2 + $0x180] sm:$0xff] }
  0x25   :  { %333 = vmatpush3.msra.mxu0 %v69_v41  ;;  %371 = vmatpush3.msra.mxu1 %v101_v42  ;;  %v63_v1 = vld [vmem:[#allocation2] sm:$0xff] }
  0x26   :  { %334 = vmatprep.subr.mxu0 %v84_v43  ;;  %372 = vmatprep.subr.mxu1 %v116_v44  ;;  %v95_v2 = vld [vmem:[#allocation2 + $0x100] sm:$0xff] }
  0x27   :  { %335 = vmatpush3.msra.mxu0 %v68_v45  ;;  %373 = vmatpush3.msra.mxu1 %v100_v46 }
  0x28   :  { %336 = vmatprep.subr.mxu0 %v83_v47  ;;  %374 = vmatprep.subr.mxu1 %v115_v48 }
  0x29   :  { %337 = vmatpush3.msra.mxu0 %v67_v49  ;;  %375 = vmatpush3.msra.mxu1 %v99_v50 }
  0x2a   :  { %338 = vmatprep.subr.mxu0 %v82_v51  ;;  %376 = vmatprep.subr.mxu1 %v114_v52 }
  0x2b   :  { %339 = vmatpush3.msra.mxu0 %v66_v53  ;;  %377 = vmatpush3.msra.mxu1 %v98_v54 }
  0x2c   :  { %340 = vmatprep.subr.mxu0 %v81_v55  ;;  %378 = vmatprep.subr.mxu1 %v113_v56 }
  0x2d   :  { %341 = vmatpush3.msra.mxu0 %v65_v57  ;;  %379 = vmatpush3.msra.mxu1 %v97_v58 }
  0x2e   :  { %342 = vmatprep.subr.mxu0 %v80_v59  ;;  %380 = vmatprep.subr.mxu1 %v112_v60 }
  0x2f   :  { %343 = vmatpush3.msra.mxu0 %v64_v61  ;;  %381 = vmatpush3.msra.mxu1 %v96_v62 }
  0x30   :  { %344 = vmatprep.subr.mxu0 %v79_v63  ;;  %382 = vmatprep.subr.mxu1 %v111_v0 }
  0x31   :  { %345 = vmatpush3.msra.mxu0 %v63_v1  ;;  %383 = vmatpush3.msra.mxu1 %v95_v2 }
  0x8b   :  { %v35_v8 = vpop.permute.xlu0 %34 }
  0x8c   :  { %vm40_vm0 = vcmp.eq.s32.totalorder %v35_v8, %v30_v5  ;;  %vm42_vm1 = vcmp.eq.s32.totalorder %v35_v8, %v32_v6  ;;  %vm39_vm2 = vcmp.eq.s32.totalorder %v35_v8, %v29_v4  ;;  %vm41_vm3 = vcmp.eq.s32.totalorder %v35_v8, %v31_v7 }
  0x8d   :  { %306 = vmatprep.mubr.msk.f32.mxu0 %vm40_vm0, %v445_v9  ;;  %310 = vmatprep.mubr.msk.f32.mxu1 %vm42_vm1, %v445_v9 }
  0x8e   :  { %307 = vmatmul.mubr.msk.f32.vlgmr.msra.gmra.mxu0 %vm39_vm2, %v445_v9  ;;  %311 = vmatmul.mubr.msk.f32.vlgmr.msra.gmra.mxu1 %vm41_vm3, %v445_v9 }
  0x90   :  { %v38_v10 = vpop.permute.xlu0 %37 }
  0x91   :  { %vm44_vm4 = vcmp.eq.s32.totalorder %v38_v10, %v30_v5  ;;  %vm46_vm5 = vcmp.eq.s32.totalorder %v38_v10, %v32_v6  ;;  %vm43_vm6 = vcmp.eq.s32.totalorder %v38_v10, %v29_v4  ;;  %vm45_vm7 = vcmp.eq.s32.totalorder %v38_v10, %v31_v7 }
  0x92   :  { %308 = vmatprep.mubr.msk.f32.mxu0 %vm44_vm4, %v445_v9  ;;  %312 = vmatprep.mubr.msk.f32.mxu1 %vm46_vm5, %v445_v9 }
  0x93   :  { %309 = vmatmul.mubr.msk.f32.gmra.mxu0 %vm43_vm6, %v445_v9  ;;  %313 = vmatmul.mubr.msk.f32.gmra.mxu1 %vm45_vm7, %v445_v9 }
 0x14e   :  { %v346_v11 = vpop.f32.mrf.mxu0  ;;  %v384_v12 = vpop.f32.mrf.mxu1 }
 0x150   :  { %v347_v13 = vpop.f32.mrf.mxu0  ;;  %v385_v14 = vpop.f32.mrf.mxu1 }
 0x151   :  { %v348_v15 = vadd.f32 %v347_v13, %v346_v11  ;;  %v386_v16 = vadd.f32 %v385_v14, %v384_v12 }
 0x153   :  { %v349_v17 = vpop.f32.mrf.mxu0  ;;  %v387_v18 = vpop.f32.mrf.mxu1  ;;  %v269_v19 = vadd.f32 %v386_v16, %v348_v15 }
 0x155   :  { %v350_v20 = vpop.f32.mrf.mxu0  ;;  %v388_v21 = vpop.f32.mrf.mxu1  ;;  %v277_v22 = vmul.f32 11.313708, %v269_v19 }
 0x156   :  { %v351_v23 = vadd.f32 %v350_v20, %v349_v17  ;;  %v389_v24 = vadd.f32 %v388_v21, %v387_v18 }
 0x157   :  { %279 = vst [vmem:[#allocation5] sm:$0xff] %v277_v22 }
 0x158   :  { %v274_v25 = vadd.f32 %v389_v24, %v351_v23 }
 0x15a   :  { %v278_v26 = vmul.f32 11.313708, %v274_v25 }
 0x15c   :  { %280 = vst [vmem:[#allocation5 + $0x8] sm:$0xff] %v278_v26 }
 0x15d   :  { %428 = shalt.err (!%p425_p9)
}
 0x15e   :  { %292 = dma.vmem_to_hbm [thread:$0]  %s287_s1, 256, %s482_s2, [#allocation4], %s442_s12, %s442_s12, %s443_s13  }
 0x15f   :  { %439 = dma.done.wait [#allocation4], 256  }
 0x160   :  { %440 = vsyncadd [#allocation4], 4294967040 }
 0x161   :  { %296 = vsyncpa [#allocation3], 1 }
 0x162   :  { %297 = vsyncpa [#allocation4], 1 }

</bundles_post_ra>
